<compile_context>
chip_gen: v5e
topology: v5e:2x2
jax: 0.10.0
libtpu: 0.0.40
codegen_flags: <defaults>
</compile_context>

<pallas_src>
import jax
import jax.numpy as jnp
from jax.experimental import pallas as pl
from jax.experimental.pallas import tpu as pltpu

IN_FEATURES = 10
HIDDEN = 5
OUT_FEATURES = 2

_PACK = 128 // OUT_FEATURES          # 64 batch rows packed per 128-lane row
_PACKED_IN = _PACK * IN_FEATURES     # 640 = 5 * 128 lanes (dense)
_PACKED_OUT = _PACK * OUT_FEATURES   # 128 lanes (dense)


def _linear_relu_kernel(x_ref, w_ref, b_ref, o_ref):
    """o = relu(x @ w + b).  Used for both the packed and row-major layouts."""
    y = jnp.dot(x_ref[...], w_ref[...], preferred_element_type=jnp.float32)
    o_ref[...] = jnp.maximum(y + b_ref[...], 0.0).astype(o_ref.dtype)


def _choose_tile(total, max_tile):
    """Tile along the batch-like axis.

    Returns either the full extent (tiny arrays) or a multiple of 8 (f32
    sublane tile) that yields at least 2 grid steps when possible, so v7x's
    two TensorCores can both get work (harmless on v5e/v6e).
    """
    if total <= 8:
        return total
    if total > max_tile:
        return max_tile                      # max_tile is a multiple of 8
    half = (((total + 1) // 2) + 7) // 8 * 8
    return half if half < total else total


_COMPILER_PARAMS = pltpu.CompilerParams(
    dimension_semantics=("parallel",),       # batch tiles are independent
    vmem_limit_bytes=32 * 1024 * 1024,       # explicit; tiles budgeted well below
)


def _forward_packed(x, w_fused, b_fused, max_rows):
    """Lane-dense path, requires B % 64 == 0."""
    B = x.shape[0]
    R = B // _PACK
    # Free (bitcast-level) reshape: (B, 10) row-major == (B//64, 640) row-major.
    xp = x.reshape(R, _PACKED_IN)
    # Block-diagonal weight: w_big[10*m + k, 2*m + o] = w_fused[k, o].
    w_big = jnp.kron(jnp.eye(_PACK, dtype=jnp.float32), w_fused)      # (640, 128)
    b_big = jnp.tile(b_fused, _PACK).reshape(1, _PACKED_OUT)          # (1, 128)

    r_blk = _choose_tile(R, max_rows)
    grid = (pl.cdiv(R, r_blk),)              # ragged trailing tile handled by Pallas

    out = pl.pallas_call(
        _linear_relu_kernel,
        out_shape=jax.ShapeDtypeStruct((R, _PACKED_OUT), jnp.float32),
        grid=grid,
        in_specs=[
            pl.BlockSpec((r_blk, _PACKED_IN), lambda i: (i, 0)),       # x tile (dense)
            pl.BlockSpec((_PACKED_IN, _PACKED_OUT), lambda i: (0, 0)),  # weight, replicated
            pl.BlockSpec((1, _PACKED_OUT), lambda i: (0, 0)),           # bias, replicated
        ],
        out_specs=pl.BlockSpec((r_blk, _PACKED_OUT), lambda i: (i, 0)),
        compiler_params=_COMPILER_PARAMS,
    )(xp, w_big, b_big)
    # Free reshape back: (B//64, 128) row-major == (B, 2) row-major.
    return out.reshape(B, OUT_FEATURES)


def _forward_rowmajor(x, w_fused, b_fused, max_tile):
    """Fallback for B not divisible by 64 (lane-sparse but still no pad/slice)."""
    B = x.shape[0]
    tb = _choose_tile(B, max_tile)
    grid = (pl.cdiv(B, tb),)                 # ragged trailing tile handled by Pallas
    return pl.pallas_call(
        _linear_relu_kernel,
        out_shape=jax.ShapeDtypeStruct((B, OUT_FEATURES), jnp.float32),
        grid=grid,
        in_specs=[
            pl.BlockSpec((tb, IN_FEATURES), lambda i: (i, 0)),
            pl.BlockSpec((IN_FEATURES, OUT_FEATURES), lambda i: (0, 0)),
            pl.BlockSpec((1, OUT_FEATURES), lambda i: (0, 0)),
        ],
        out_specs=pl.BlockSpec((tb, OUT_FEATURES), lambda i: (i, 0)),
        compiler_params=_COMPILER_PARAMS,
    )(x, w_fused, b_fused.reshape(1, OUT_FEATURES))


def net_forward(x, w1, b1, w2, b2, *, max_packed_rows=1024, max_batch_tile=4096,
                jnp_below=0):
    """Forward pass of Net: relu(fc2(fc1(x))).

    x : (B, 10) float32
    w1: (5, 10), b1: (5,), w2: (2, 5), b2: (2,)   (PyTorch Linear layout)
    returns (B, 2) float32
    """
    B, F = x.shape
    assert F == IN_FEATURES

    # Fuse the two linears once at trace time (no activation between them).
    w_fused = jnp.dot(w2, w1).T.astype(jnp.float32)              # (10, 2)
    b_fused = (jnp.dot(w2, b1) + b2).astype(jnp.float32)         # (2,)

    if B < jnp_below:
        # For genuinely tiny batches a pallas_call's launch cost dominates;
        # set jnp_below ~2048 in production to let XLA fuse this trivially.
        return jnp.maximum(x @ w_fused + b_fused, 0.0)

    if B % _PACK == 0:
        return _forward_packed(x, w_fused, b_fused, max_packed_rows)
    return _forward_rowmajor(x, w_fused, b_fused, max_batch_tile)


def _reference(x, w1, b1, w2, b2):
    return jnp.maximum((x @ w1.T + b1) @ w2.T + b2, 0.0)


if __name__ == "__main__":
    key = jax.random.PRNGKey(0)
    k_w1, k_b1, k_w2, k_b2, k_x1, k_x2, k_x3 = jax.random.split(key, 7)

    # Deterministic parameters (PyTorch Linear shape conventions).
    w1 = jax.random.normal(k_w1, (HIDDEN, IN_FEATURES), dtype=jnp.float32) * 0.1
    b1 = jax.random.normal(k_b1, (HIDDEN,), dtype=jnp.float32) * 0.1
    w2 = jax.random.normal(k_w2, (OUT_FEATURES, HIDDEN), dtype=jnp.float32) * 0.1
    b2 = jax.random.normal(k_b2, (OUT_FEATURES,), dtype=jnp.float32) * 0.1

    # --- B % 64 == 0: packed lane-dense kernel, grid of 2 tiles ---
    B1 = 1024
    x1 = jax.random.normal(k_x1, (B1, IN_FEATURES), dtype=jnp.float32)
    out1 = jax.block_until_ready(net_forward(x1, w1, b1, w2, b2))
    ref1 = _reference(x1, w1, b1, w2, b2)
    assert out1.shape == (B1, OUT_FEATURES)
    assert jnp.allclose(out1, ref1, atol=1e-4, rtol=1e-4), \
        float(jnp.max(jnp.abs(out1 - ref1)))

    # --- B % 64 == 0 but not a tile multiple: packed kernel, ragged last tile ---
    B3 = 1344  # R = 21 packed rows -> tiles of 16 + ragged 5
    x3 = jax.random.normal(k_x3, (B3, IN_FEATURES), dtype=jnp.float32)
    out3 = jax.block_until_ready(net_forward(x3, w1, b1, w2, b2))
    ref3 = _reference(x3, w1, b1, w2, b2)
    assert out3.shape == (B3, OUT_FEATURES)
    assert jnp.allclose(out3, ref3, atol=1e-4, rtol=1e-4), \
        float(jnp.max(jnp.abs(out3 - ref3)))

    # --- B % 64 != 0: row-major fallback, ragged trailing tile, no pad/slice ---
    B2 = 1000
    x2 = jax.random.normal(k_x2, (B2, IN_FEATURES), dtype=jnp.float32)
    out2 = jax.block_until_ready(net_forward(x2, w1, b1, w2, b2))
    ref2 = _reference(x2, w1, b1, w2, b2)
    assert out2.shape == (B2, OUT_FEATURES)
    assert jnp.allclose(out2, ref2, atol=1e-4, rtol=1e-4), \
        float(jnp.max(jnp.abs(out2 - ref2)))

    print("KERNEL_OK")
</pallas_src>

<mosaic_0001>
module attributes {stable_mosaic.version = 11 : i64} {
  func.func @_linear_relu_kernel(%arg0: i32, %arg1: memref<8x640xf32, #tpu.memory_space<vmem>>, %arg2: memref<640x128xf32, #tpu.memory_space<vmem>>, %arg3: memref<1x128xf32, #tpu.memory_space<vmem>>, %arg4: memref<8x128xf32, #tpu.memory_space<vmem>>) attributes {dimension_semantics = [#tpu.dimension_semantics<parallel>], iteration_bounds = array<i64: 2>, scalar_prefetch = 0 : i64, scratch_operands = 0 : i64, tpu.core_type = #tpu.core_type<tc>, window_params = [{transform_indices = @transform_0, window_bounds = array<i64: 8, 640>}, {pipeline_mode = #tpu.pipeline_mode<synchronous>, transform_indices = @transform_1, window_bounds = array<i64: 640, 128>}, {pipeline_mode = #tpu.pipeline_mode<synchronous>, transform_indices = @transform_2, window_bounds = array<i64: 1, 128>}, {transform_indices = @transform_3, window_bounds = array<i64: 8, 128>}]} {
    %c0 = arith.constant 0 : index
    %c0_0 = arith.constant 0 : index
    %0 = vector.load %arg1[%c0, %c0_0] : memref<8x640xf32, #tpu.memory_space<vmem>>, vector<8x640xf32>
    %c0_1 = arith.constant 0 : index
    %c0_2 = arith.constant 0 : index
    %1 = vector.load %arg2[%c0_1, %c0_2] : memref<640x128xf32, #tpu.memory_space<vmem>>, vector<640x128xf32>
    %cst = arith.constant dense<0.000000e+00> : vector<8x128xf32>
    %2 = tpu.matmul %0, %1, %cst {dimension_numbers = #tpu.dot_dimension_numbers<[1], [0], [0], [1], [0, 0, 1, 1], [], []>} : vector<8x640xf32>, vector<640x128xf32>, vector<8x128xf32> -> vector<8x128xf32>
    %c0_3 = arith.constant 0 : index
    %c0_4 = arith.constant 0 : index
    %3 = vector.load %arg3[%c0_3, %c0_4] : memref<1x128xf32, #tpu.memory_space<vmem>>, vector<1x128xf32>
    %4 = vector.broadcast %3 : vector<1x128xf32> to vector<8x128xf32>
    %5 = arith.addf %2, %4 : vector<8x128xf32>
    %cst_5 = arith.constant 0.000000e+00 : f32
    %6 = vector.broadcast %cst_5 : f32 to vector<8x128xf32>
    %7 = arith.maximumf %5, %6 : vector<8x128xf32>
    %c0_6 = arith.constant 0 : index
    %c0_7 = arith.constant 0 : index
    %8 = vector.load %arg4[%c0_6, %c0_7] : memref<8x128xf32, #tpu.memory_space<vmem>>, vector<8x128xf32>
    tpu.vector_store %arg4[%c0_6, %c0_7], %7 {strides = array<i32>} : memref<8x128xf32, #tpu.memory_space<vmem>>, vector<8x128xf32>,
    return
  }
  func.func @transform_0(%arg0: i32) -> (i32, i32) {
    %c0_i32 = arith.constant 0 : i32
    %c0_i32_0 = arith.constant 0 : i32
    return %arg0, %c0_i32 : i32, i32
  }
  func.func @transform_1(%arg0: i32) -> (i32, i32) {
    %c0_i32 = arith.constant 0 : i32
    %c0_i32_0 = arith.constant 0 : i32
    %c0_i32_1 = arith.constant 0 : i32
    return %c0_i32, %c0_i32_0 : i32, i32
  }
  func.func @transform_2(%arg0: i32) -> (i32, i32) {
    %c0_i32 = arith.constant 0 : i32
    %c0_i32_0 = arith.constant 0 : i32
    %c0_i32_1 = arith.constant 0 : i32
    return %c0_i32, %c0_i32_0 : i32, i32
  }
  func.func @transform_3(%arg0: i32) -> (i32, i32) {
    %c0_i32 = arith.constant 0 : i32
    %c0_i32_0 = arith.constant 0 : i32
    return %arg0, %c0_i32 : i32, i32
  }
}

</mosaic_0001>

<bundles_post_ra>
// kernel: tpu_custom_call.1
= control target key start
LH: loop header
LB: loop body
LE: loop exit
PB: predicated region body
PF: predicated region fallthrough
CT: control target
= control target key end

     0   :  { %8 = vsyncpa [#allocation3], 0  ;;  %s870_s0 = inlined_call_operand.hbm [shape: f32[16,640], index: 0, kind: input, shape index: {}]   ;;  %s871_s1 = inlined_call_operand.hbm [shape: f32[640,128], index: 1, kind: input, shape index: {}]   ;;  %s872_s2 = inlined_call_operand.vmem [shape: f32[1,128], index: 2, kind: input, shape index: {}]   ;;  %s873_s3 = inlined_call_operand.hbm [shape: f32[16,128], index: 3, kind: output, shape index: {}]  }
   0x1   :  { %10 = vsyncpa [#allocation3 + $0x1], 0 }
   0x2   :  { %11 = vsyncpa [#allocation6], 0 }
   0x3   :  { %12 = vsyncpa [#allocation4], 0 }
   0x4   :  { %14 = vsyncpa [#allocation4 + $0x1], 0  ;;  %s723_s12 = smov 0   ;;  %s725_s13 = smov 0  }
   0x5   :  { %s727_s14 = smov 0   ;;  %s729_s15 = smov 0  }
   0x6 LB: > { %s130_s18 = sshll.u32 %s871_s1, 4  ;;  %s747_s19 = sadd.s32 4294967295, %s698_s15   ;;  %s698_s15 = sphi %s729_s15, %s883_s15   ;;  %s694_s14 = sphi %s727_s14, %s882_s14   ;;  %s690_s13 = sphi %s725_s13, %s881_s13   ;;  %s686_s12 = sphi %s723_s12, %s880_s12   ;;  %s131_s18 = int_to_ptr.hbm [resolvable:$true] %s130_s18 }
   0x7   : > { %p494_p0 = scmp.ge.s32.totalorder %s698_s15, 1  ;;  %p41_p1 = scmp.eq.s32.totalorder %s747_s19, 0 }
   0x8   : > { %p119_p2 = scmp.lt.s32.totalorder %s698_s15, 3  ;;  %s700_s21 = smov [#allocation5]  }
   0x9   : > { %s132_s22 = sshll.u32 %s700_s21, 4  ;;  %s701_s23 = smov 128   ;;  %s133_s22 = int_to_ptr.vmem [resolvable:$true] %s132_s22 }
   0xa   : > { %p752_p3 = pnand %p494_p0, %p119_p2  ;;  %s702_s24 = smov 8  }
   0xb   : > { %s493_s25 = sadd.s32 4294967294, %s698_s15   ;;  %s763_s26 = sadd.s32 1, %s698_s15  }
   0xc   : > { %p516_p4 = pneg %p752_p3  ;;  %s27_s27 = sadd.s32 1, %s694_s14 }
   0xd   : > { %s24_s28 = ssub.s32 %s698_s15, %s763_s26  ;;  %p34_p7 = scmp.ne.s32.totalorder %s694_s14, %s690_s13 }
   0xe   : > { %p517_p6 = pnand %p516_p4, %p41_p1  ;;  %p25_p8 = scmp.eq.s32.totalorder %s24_s28, 0 }
   0xf   : > { %p35_p9 = scmp.eq.s32.totalorder %s698_s15, 0  ;;  %p40_p10 = scmp.ne.s32.totalorder %s690_s13, %s686_s12 }
  0x10   : > { %519 = dma.hbm_to_vmem [thread:$0]  (!%p517_p6), %s131_s18, 10240, %s133_s22, [#allocation6], %s701_s23, %s701_s23, %s702_s24  }
  0x11   : > { %p106_p11 = scmp.eq.s32.totalorder %s747_s19, 1  ;;  %p36_p12 = por %p35_p9, %p34_p7 }
  0x12   : > { %s775_s29 = scalar_select %p25_p8, %s694_s14, %s27_s27  }
  0x13   : > { %p779_p13 = por %p41_p1, %p40_p10  ;;  %p783_p0 = por %p106_p11, %p34_p7 }
  0x14   : > { %p112_p2 = scmp.eq.s32.totalorder %s493_s25, 1  ;;  %p529_p4 = scmp.lt.s32.totalorder %s698_s15, 2 }
  0x15   : > { %s149_s5 = sand.u32 1, %s694_s14   ;;  %s506_s9 = smul.u32 40, %s698_s15 }
  0x16   : > { %p789_p6 = por %p112_p2, %p40_p10  ;;  %s505_s7 = smul.u32 40, %s149_s5 }
  0x17   : > { %p793_p8 = pnand %p529_p4, %p36_p12  ;;  %s158_s16 = scalar_lea.hbm %s870_s0, %s506_s9 }
  0x18   : > { %s153_s17 = scalar_lea.vmem [#allocation2], %s505_s7  ;;  %s160_s21 = sshll.u32 %s158_s16, 4  ;;  %s161_s21 = int_to_ptr.hbm [resolvable:$true] %s160_s21 }
  0x19   : > { %s162_s18 = sshll.u32 %s153_s17, 4  ;;  %s150_s22 = scalar_lea.sflag [#allocation3], %s149_s5  ;;  %s163_s18 = int_to_ptr.vmem [resolvable:$true] %s162_s18 }
  0x1a   : > { %s598_s23 = sshra.s32 %s161_s21, 4  ;;  %p602_p9 = pneg %p793_p8  ;;  %s599_s23 = int_to_ptr.hbm [resolvable:$true] %s598_s23 }
  0x1b   : > { %s600_s24 = scalar_lea.hbm %s599_s23, 40  ;;  %s605_s28 = scalar_lea.hbm %s870_s0, 80 }
  0x1c   : > { %p601_p7 = scmp.ne.s32.totalorder %s599_s23, %s600_s24  ;;  %p606_p12 = scmp.lt.s32.totalorder %s599_s23, %s870_s0 }
  0x1d   : > { %p607_p2 = scmp.lt.s32.totalorder %s605_s28, %s600_s24 }
  0x1e   : > { %p603_p10 = pnand %p602_p9, %p601_p7 }
  0x1f   : > { %p608_p4 = por %p607_p2, %p606_p12 }
  0x20   : > { %p604_p11 = pneg %p603_p10 }
  0x22   : > { %p609_p5 = pnand %p608_p4, %p604_p11 }
  0x24   : > { %612 = shalt.err (!%p609_p5)
}
  0x25   : > { %523 = dma.hbm_to_vmem [thread:$0]  (!%p793_p8), %s161_s21, 640, %s163_s18, %s150_s22  }
  0x26   : > { %171 = sbr.rel (%p752_p3) target bundleno = 243 (0xf3), region = 32  ;;  %s814_s5 = sand.u32 (!%p752_p3), 1, %s690_s13  }
  0x27   : > { %s507_s7 = smul.u32 (!%p752_p3), 40, %s814_s5  ;;  %s174_s11 = scalar_lea.sflag (!%p752_p3), [#allocation3], %s814_s5 }
  0x29   : > { %s818_s16 = scalar_lea.vmem (!%p752_p3), [#allocation2], %s507_s7 }
  0x2b   : > { %673 = dma.done.wait (%p779_p13), %s174_s11, 640  }
  0x2c   : > { %675 = vsyncadd (%p779_p13), %s174_s11, 4294966656 }
  0x2d   : > { %677 = dma.done.wait (%p41_p1), [#allocation6], 10240  }
  0x2e   : > { %679 = vsyncadd (%p41_p1), [#allocation6], 4294957056  ;;  %v226_v0 = vld [vmem:[#allocation5 + $0x78] sm:$0xff]  ;;  %v225_v1 = vld [vmem:[#allocation5 + $0x70] sm:$0xff]  ;;  %s500_s8 = sshll.u32 %s814_s5, 3  ;;  %s502_s17 = sshll.u32 %s747_s19, 3 }
  0x2f   : > { %295 = vmatpush.msra.mxu0 %v226_v0  ;;  %v224_v2 = vld [vmem:[#allocation5 + $0x68] sm:$0xff]  ;;  %v258_v3 = vld [vmem:[#allocation5 + $0x178] sm:$0xff]  ;;  %v223_v4 = vld [vmem:[#allocation5 + $0x60] sm:$0xff]  ;;  %s408_s22 = scalar_lea.hbm %s873_s3, %s502_s17  ;;  %s205_s23 = scalar_lea.vmem [#allocation7], %s500_s8 }
  0x30   : > { %335 = vmatpush.msra.mxu2 %v258_v3  ;;  %v257_v5 = vld [vmem:[#allocation5 + $0x170] sm:$0xff]  ;;  %v274_v6 = vld [vmem:[#allocation5 + $0x1f8] sm:$0xff]  ;;  %v256_v8 = vld [vmem:[#allocation5 + $0x168] sm:$0xff]  ;;  %s410_s24 = sshll.u32 %s205_s23, 4  ;;  %s412_s25 = sshll.u32 %s408_s22, 4  ;;  %s411_s24 = int_to_ptr.vmem [resolvable:$true] %s410_s24  ;;  %s413_s25 = int_to_ptr.hbm [resolvable:$true] %s412_s25 }
  0x31   : > { %296 = vmatpush.msra.mxu0 %v225_v1  ;;  %355 = vmatpush.msra.mxu3 %v274_v6  ;;  %v242_v7 = vld [vmem:[#allocation5 + $0xf8] sm:$0xff]  ;;  %v273_v10 = vld [vmem:[#allocation5 + $0x1f0] sm:$0xff]  ;;  %v255_v12 = vld [vmem:[#allocation5 + $0x160] sm:$0xff]  ;;  %s398_s27 = scalar_lea.sflag [#allocation4], %s814_s5  ;;  %s642_s28 = sshra.s32 %s413_s25, 4  ;;  %s643_s28 = int_to_ptr.hbm [resolvable:$true] %s642_s28 }
  0x32   : > { %v222_v9 = vld [vmem:[#allocation5 + $0x58] sm:$0xff]  ;;  %336 = vmatpush.msra.mxu2 %v257_v5  ;;  %315 = vmatpush.msra.mxu1 %v242_v7  ;;  %v241_v11 = vld [vmem:[#allocation5 + $0xf0] sm:$0xff]  ;;  %v272_v13 = vld [vmem:[#allocation5 + $0x1e8] sm:$0xff]  ;;  %s644_s10 = scalar_lea.hbm %s643_s28, 8  ;;  %s648_s7 = scalar_lea.hbm %s873_s3, 16 }
  0x33   : > { %297 = vmatpush.msra.mxu0 %v224_v2  ;;  %356 = vmatpush.msra.mxu3 %v273_v10  ;;  %v221_v14 = vld [vmem:[#allocation5 + $0x50] sm:$0xff]  ;;  %v240_v15 = vld [vmem:[#allocation5 + $0xe8] sm:$0xff]  ;;  %v271_v16 = vld [vmem:[#allocation5 + $0x1e0] sm:$0xff]  ;;  %p645_p1 = scmp.ne.s32.totalorder %s643_s28, %s644_s10  ;;  %p649_p13 = scmp.lt.s32.totalorder %s643_s28, %s873_s3 }
  0x34   : > { %337 = vmatpush.msra.mxu2 %v256_v8  ;;  %316 = vmatpush.msra.mxu1 %v241_v11  ;;  %v254_v17 = vld [vmem:[#allocation5 + $0x158] sm:$0xff]  ;;  %v239_v18 = vld [vmem:[#allocation5 + $0xe0] sm:$0xff]  ;;  %v220_v19 = vld [vmem:[#allocation5 + $0x48] sm:$0xff]  ;;  %p650_p8 = scmp.lt.s32.totalorder %s648_s7, %s644_s10 }
  0x35   : > { %298 = vmatpush.msra.mxu0 %v223_v4  ;;  %357 = vmatpush.msra.mxu3 %v272_v13  ;;  %v270_v20 = vld [vmem:[#allocation5 + $0x1d8] sm:$0xff]  ;;  %v253_v21 = vld [vmem:[#allocation5 + $0x150] sm:$0xff]  ;;  %v219_v23 = vld [vmem:[#allocation5 + $0x40] sm:$0xff]  ;;  %p646_p3 = pnand %p645_p1, %p783_p0 }
  0x36   : > { %338 = vmatpush.msra.mxu2 %v255_v12  ;;  %317 = vmatpush.msra.mxu1 %v240_v15  ;;  %v238_v22 = vld [vmem:[#allocation5 + $0xd8] sm:$0xff]  ;;  %v269_v24 = vld [vmem:[#allocation5 + $0x1d0] sm:$0xff]  ;;  %v252_v25 = vld [vmem:[#allocation5 + $0x148] sm:$0xff]  ;;  %p651_p7 = por %p650_p8, %p649_p13 }
  0x37   : > { %299 = vmatpush.msra.mxu0 %v222_v9  ;;  %358 = vmatpush.msra.mxu3 %v271_v16  ;;  %v237_v26 = vld [vmem:[#allocation5 + $0xd0] sm:$0xff]  ;;  %v218_v27 = vld [vmem:[#allocation5 + $0x38] sm:$0xff]  ;;  %v268_v28 = vld [vmem:[#allocation5 + $0x1c8] sm:$0xff]  ;;  %p647_p5 = pneg %p646_p3 }
  0x38   : > { %339 = vmatpush.msra.mxu2 %v254_v17  ;;  %318 = vmatpush.msra.mxu1 %v239_v18  ;;  %v251_v29 = vld [vmem:[#allocation5 + $0x140] sm:$0xff]  ;;  %v236_v30 = vld [vmem:[#allocation5 + $0xc8] sm:$0xff]  ;;  %v217_v31 = vld [vmem:[#allocation5 + $0x30] sm:$0xff] }
  0x39   : > { %300 = vmatpush.msra.mxu0 %v221_v14  ;;  %359 = vmatpush.msra.mxu3 %v270_v20  ;;  %v267_v32 = vld [vmem:[#allocation5 + $0x1c0] sm:$0xff]  ;;  %v250_v33 = vld [vmem:[#allocation5 + $0x138] sm:$0xff]  ;;  %v216_v35 = vld [vmem:[#allocation5 + $0x28] sm:$0xff]  ;;  %p652_p9 = pnand %p651_p7, %p647_p5 }
  0x3a   : > { %340 = vmatpush.msra.mxu2 %v253_v21  ;;  %319 = vmatpush.msra.mxu1 %v238_v22  ;;  %v235_v34 = vld [vmem:[#allocation5 + $0xc0] sm:$0xff]  ;;  %v266_v36 = vld [vmem:[#allocation5 + $0x1b8] sm:$0xff]  ;;  %v249_v37 = vld [vmem:[#allocation5 + $0x130] sm:$0xff] }
  0x3b   : > { %301 = vmatpush.msra.mxu0 %v220_v19  ;;  %360 = vmatpush.msra.mxu3 %v269_v24  ;;  %v234_v38 = vld [vmem:[#allocation5 + $0xb8] sm:$0xff]  ;;  %v215_v39 = vld [vmem:[#allocation5 + $0x20] sm:$0xff]  ;;  %v265_v40 = vld [vmem:[#allocation5 + $0x1b0] sm:$0xff] }
  0x3c   : > { %341 = vmatpush.msra.mxu2 %v252_v25  ;;  %320 = vmatpush.msra.mxu1 %v237_v26  ;;  %v248_v41 = vld [vmem:[#allocation5 + $0x128] sm:$0xff]  ;;  %v233_v42 = vld [vmem:[#allocation5 + $0xb0] sm:$0xff]  ;;  %v214_v43 = vld [vmem:[#allocation5 + $0x18] sm:$0xff] }
  0x3d   : > { %302 = vmatpush.msra.mxu0 %v219_v23  ;;  %361 = vmatpush.msra.mxu3 %v268_v28  ;;  %v264_v44 = vld [vmem:[#allocation5 + $0x1a8] sm:$0xff]  ;;  %v247_v45 = vld [vmem:[#allocation5 + $0x120] sm:$0xff]  ;;  %v213_v47 = vld [vmem:[#allocation5 + $0x10] sm:$0xff] }
  0x3e   : > { %342 = vmatpush.msra.mxu2 %v251_v29  ;;  %321 = vmatpush.msra.mxu1 %v236_v30  ;;  %v232_v46 = vld [vmem:[#allocation5 + $0xa8] sm:$0xff]  ;;  %v263_v48 = vld [vmem:[#allocation5 + $0x1a0] sm:$0xff]  ;;  %v246_v49 = vld [vmem:[#allocation5 + $0x118] sm:$0xff] }
  0x3f   : > { %303 = vmatpush.msra.mxu0 %v218_v27  ;;  %362 = vmatpush.msra.mxu3 %v267_v32  ;;  %v231_v50 = vld [vmem:[#allocation5 + $0xa0] sm:$0xff]  ;;  %v212_v51 = vld [vmem:[#allocation5 + $0x8] sm:$0xff]  ;;  %v262_v52 = vld [vmem:[#allocation5 + $0x198] sm:$0xff] }
  0x40   : > { %343 = vmatpush.msra.mxu2 %v250_v33  ;;  %322 = vmatpush.msra.mxu1 %v235_v34  ;;  %v245_v53 = vld [vmem:[#allocation5 + $0x110] sm:$0xff]  ;;  %v230_v54 = vld [vmem:[#allocation5 + $0x98] sm:$0xff]  ;;  %v211_v55 = vld [vmem:[#allocation5] sm:$0xff] }
  0x41   : > { %304 = vmatpush.msra.mxu0 %v217_v31  ;;  %363 = vmatpush.msra.mxu3 %v266_v36  ;;  %v261_v56 = vld [vmem:[#allocation5 + $0x190] sm:$0xff]  ;;  %v290_v57 = vld [vmem:[#allocation5 + $0x278] sm:$0xff]  ;;  %v244_v58 = vld [vmem:[#allocation5 + $0x108] sm:$0xff] }
  0x42   : > { %344 = vmatpush.msra.mxu2 %v249_v37  ;;  %323 = vmatpush.msra.mxu1 %v234_v38  ;;  %v229_v59 = vld [vmem:[#allocation5 + $0x90] sm:$0xff]  ;;  %v260_v60 = vld [vmem:[#allocation5 + $0x188] sm:$0xff]  ;;  %v243_v62 = vld [vmem:[#allocation5 + $0x100] sm:$0xff] }
  0x43   : > { %305 = vmatpush.msra.mxu0 %v216_v35  ;;  %364 = vmatpush.msra.mxu3 %v265_v40  ;;  %v289_v61 = vld [vmem:[#allocation5 + $0x270] sm:$0xff]  ;;  %v208_v63 = vld [vmem:[%s818_s16 + $0x10] sm:$0xff]  ;;  %v207_v7 = vld [vmem:[%s818_s16 + $0x8] sm:$0xff] }
  0x44   : > { %345 = vmatpush.msra.mxu2 %v248_v41  ;;  %324 = vmatpush.msra.mxu1 %v233_v42  ;;  %v228_v0 = vld [vmem:[#allocation5 + $0x88] sm:$0xff]  ;;  %v259_v2 = vld [vmem:[#allocation5 + $0x180] sm:$0xff]  ;;  %v206_v3 = vld [vmem:[%s818_s16] sm:$0xff] }
  0x45   : > { %306 = vmatpush.msra.mxu0 %v215_v39  ;;  %365 = vmatpush.msra.mxu3 %v264_v44  ;;  %v288_v1 = vld [vmem:[#allocation5 + $0x268] sm:$0xff]  ;;  %v287_v5 = vld [vmem:[#allocation5 + $0x260] sm:$0xff]  ;;  %v286_v8 = vld [vmem:[#allocation5 + $0x258] sm:$0xff] }
  0x46   : > { %346 = vmatpush.msra.mxu2 %v247_v45  ;;  %325 = vmatpush.msra.mxu1 %v232_v46  ;;  %v209_v4 = vld [vmem:[%s818_s16 + $0x18] sm:$0xff]  ;;  %v227_v6 = vld [vmem:[#allocation5 + $0x80] sm:$0xff]  ;;  %v282_v12 = vld [vmem:[#allocation5 + $0x238] sm:$0xff] }
  0x47   : > { %307 = vmatpush.msra.mxu0 %v214_v43  ;;  %366 = vmatpush.msra.mxu3 %v263_v48  ;;  %v285_v9 = vld [vmem:[#allocation5 + $0x250] sm:$0xff]  ;;  %v284_v10 = vld [vmem:[#allocation5 + $0x248] sm:$0xff]  ;;  %v283_v11 = vld [vmem:[#allocation5 + $0x240] sm:$0xff] }
  0x48   : > { %347 = vmatpush.msra.mxu2 %v246_v49  ;;  %326 = vmatpush.msra.mxu1 %v231_v50  ;;  %v281_v13 = vld [vmem:[#allocation5 + $0x230] sm:$0xff]  ;;  %v280_v14 = vld [vmem:[#allocation5 + $0x228] sm:$0xff]  ;;  %v279_v15 = vld [vmem:[#allocation5 + $0x220] sm:$0xff] }
  0x49   : > { %308 = vmatpush.msra.mxu0 %v213_v47  ;;  %367 = vmatpush.msra.mxu3 %v262_v52  ;;  %v278_v16 = vld [vmem:[#allocation5 + $0x218] sm:$0xff]  ;;  %v277_v17 = vld [vmem:[#allocation5 + $0x210] sm:$0xff]  ;;  %v276_v18 = vld [vmem:[#allocation5 + $0x208] sm:$0xff] }
  0x4a   : > { %348 = vmatpush.msra.mxu2 %v245_v53  ;;  %327 = vmatpush.msra.mxu1 %v230_v54  ;;  %v275_v19 = vld [vmem:[#allocation5 + $0x200] sm:$0xff]  ;;  %v210_v20 = vld [vmem:[%s818_s16 + $0x20] sm:$0xff] }
  0x4b   : > { %309 = vmatpush.msra.mxu0 %v212_v51  ;;  %368 = vmatpush.msra.mxu3 %v261_v56  ;;  %v567_v21 = vld [vmem:[%s872_s2] ss:$0 sm:$0xff] }
  0x4c   : > { %349 = vmatpush.msra.mxu2 %v244_v58  ;;  %328 = vmatpush.msra.mxu1 %v229_v59 }
  0x4d   : > { %310 = vmatpush.msra.mxu0 %v211_v55  ;;  %369 = vmatpush.msra.mxu3 %v260_v60 }
  0x4e   : > { %350 = vmatpush.msra.mxu2 %v243_v62  ;;  %329 = vmatpush.msra.mxu1 %v228_v0 }
  0x4f   : > { %375 = vmatpush.msrb.mxu0 %v290_v57  ;;  %351 = vmatmul.f32.vlgmr.msra.gmra.mxu2 %v208_v63 }
  0x50   : > { %370 = vmatpush.msra.mxu3 %v259_v2  ;;  %311 = vmatmul.f32.vlgmr.msra.gmra.mxu0 %v206_v3 }
  0x51   : > { %376 = vmatpush.msrb.mxu0 %v289_v61  ;;  %371 = vmatmul.f32.vlgmr.msra.gmra.mxu3 %v209_v4 }
  0x52   : > { %330 = vmatpush.msra.mxu1 %v227_v6 }
  0x53   : > { %377 = vmatpush.msrb.mxu0 %v288_v1  ;;  %331 = vmatmul.f32.vlgmr.msra.gmra.mxu1 %v207_v7 }
  0x55   : > { %378 = vmatpush.msrb.mxu0 %v287_v5 }
  0x57   : > { %379 = vmatpush.msrb.mxu0 %v286_v8 }
  0x59   : > { %380 = vmatpush.msrb.mxu0 %v285_v9 }
  0x5b   : > { %381 = vmatpush.msrb.mxu0 %v284_v10 }
  0x5d   : > { %382 = vmatpush.msrb.mxu0 %v283_v11 }
  0x5f   : > { %383 = vmatpush.msrb.mxu0 %v282_v12 }
  0x61   : > { %384 = vmatpush.msrb.mxu0 %v281_v13 }
  0x63   : > { %385 = vmatpush.msrb.mxu0 %v280_v14 }
  0x65   : > { %386 = vmatpush.msrb.mxu0 %v279_v15 }
  0x67   : > { %387 = vmatpush.msrb.mxu0 %v278_v16 }
  0x69   : > { %388 = vmatpush.msrb.mxu0 %v277_v17 }
  0x6b   : > { %389 = vmatpush.msrb.mxu0 %v276_v18 }
  0x6d   : > { %390 = vmatpush.msrb.mxu0 %v275_v19 }
  0x6e   : > { %391 = vmatmul.f32.vlgmr.msrb.gmra.mxu0 %v210_v20 }
  0xcd   : > { %v312_v22 = vpop.f32.mrf.mxu0 }
  0xce   : > { %v313_v23 = vadd.f32 %v567_v21, %v312_v22 }
  0xd0   : > { %v332_v24 = vpop.f32.mrf.mxu1 }
  0xd1   : > { %v333_v25 = vadd.f32 %v332_v24, %v313_v23 }
  0xd2   : > { %v352_v26 = vpop.f32.mrf.mxu2 }
  0xd3   : > { %v353_v27 = vadd.f32 %v352_v26, %v333_v25 }
  0xd4   : > { %v372_v28 = vpop.f32.mrf.mxu3 }
  0xd5   : > { %v373_v29 = vadd.f32 %v372_v28, %v353_v27 }
  0xeb   : > { %v392_v30 = vpop.f32.mrf.mxu0 }
  0xec   : > { %v393_v31 = vadd.f32 %v392_v30, %v373_v29 }
  0xee   : > { %v395_v32 = vmax.f32 %v393_v31, 0.0 }
  0xf0   : > { %396 = vst [vmem:[%s205_s23] sm:$0xff] %v395_v32 }
  0xf1   : > { %655 = shalt.err (!%p652_p9)
}
  0xf2   : > { %514 = dma.vmem_to_hbm [thread:$0]  (%p783_p0), %s411_s24, 128, %s413_s25, %s398_s27  }
  0xf3 PF: > { %s424_s5 = sand.u32 1, %s686_s12   ;;  %p879_p10 = scmp.ge.s32.totalorder %s698_s15, 2 }
  0xf4   : > { %s425_s20 = scalar_lea.sflag [#allocation4], %s424_s5 }
  0xf5   : > { %p525_p11 = pnand %p879_p10, %p789_p6 }
  0xf7   : > { %p526_p12 = pneg %p525_p11 }
  0xf9   : > { %681 = dma.done.wait (%p526_p12), %s425_s20, 128  }
  0xfa   : > { %683 = vsyncadd (%p526_p12), %s425_s20, 4294967168  ;;  %p17_p2 = scmp.ge.s32.totalorder %s763_s26, 4   ;;  %s880_s12 = smov %s690_s13 }
  0xfb   : > { %s881_s13 = smov %s694_s14  ;;  %s882_s14 = smov %s775_s29 }
  0xfc   : > { %s883_s15 = smov %s763_s26  ;;  %19 = sbr.rel (!%p17_p2) target bundleno = 6 (0x6), region = 81 }
 0x101   :  { %431 = vsyncpa [#allocation3], 1 }
 0x102   :  { %433 = vsyncpa [#allocation3 + $0x1], 1 }
 0x103   :  { %434 = vsyncpa [#allocation6], 1 }
 0x104   :  { %435 = vsyncpa [#allocation4], 1 }
 0x105   :  { %437 = vsyncpa [#allocation4 + $0x1], 1 }

</bundles_post_ra>
